<compile_context>
chip_gen: v6e
topology: v6e:2x2x1
jax: 0.10.0
libtpu: 0.0.40
codegen_flags: <defaults>
</compile_context>

<pallas_src>
import math

import jax
import jax.numpy as jnp
from jax.experimental import pallas as pl
from jax.experimental.pallas import tpu as pltpu


# ----------------------------- Fused FFN kernel -----------------------------

def _ffn_kernel(x_ref, w1_ref, b1_ref, w2_ref, b2_ref, o_ref):
    """One (row-tile, hidden-tile) grid step of the fused FFN.

    x_ref : (tm, D)   f32  (cast to bf16 in-kernel for the MXU)
    w1_ref: (D, th)   bf16
    b1_ref: (1, th)   f32
    w2_ref: (th, D)   bf16
    b2_ref: (1, D)    f32
    o_ref : (tm, D)   f32  (same block index across h -> resident accumulator)
    """
    h = pl.program_id(1)

    # Initialize the resident output tile with the second bias so the last
    # hidden step needs no epilogue at all.
    @pl.when(h == 0)
    def _():
        o_ref[...] = jnp.broadcast_to(b2_ref[...], o_ref.shape)

    # linear1 slice + ReLU — the hidden intermediate only ever exists as a
    # (tm, th) VMEM value, never in HBM.
    x_bf = x_ref[...].astype(jnp.bfloat16)
    hmid = jnp.dot(x_bf, w1_ref[...], preferred_element_type=jnp.float32)
    hmid = jnp.maximum(hmid + b1_ref[...], 0.0)
    # dropout(p=drop_prob) is the identity at inference time.
    # TODO(synk): training-mode dropout would need pltpu.prng_seed/prng_random_bits.

    # linear2 partial product over this hidden slice, accumulated (f32) in o_ref.
    o_ref[...] += jnp.dot(hmid.astype(jnp.bfloat16), w2_ref[...],
                          preferred_element_type=jnp.float32)


# ----------------------------- Tiling helpers -----------------------------

def _vmem_capacity_bytes():
    try:
        return int(pltpu.get_tpu_info().vmem_capacity_bytes)
    except Exception:
        return 64 * 1024 * 1024  # conservative fallback (v7x per-TC VMEM)


def _pick_tile(dim, target, aligns):
    """Largest divisor of `dim` that is <= target and a multiple of one of
    `aligns` (tried in order); falls back to the full dim."""
    if dim <= target:
        return dim
    for align in aligns:
        if dim % align == 0:
            t = (target // align) * align
            while t >= align:
                if dim % t == 0:
                    return t
                t -= align
    return dim


def _vmem_estimate(tm, th, D, x_itemsize=4, out_itemsize=4):
    """Rough VMEM footprint assuming double-buffering of every operand."""
    return 2 * (tm * D * x_itemsize      # x tile (f32)
                + D * th * 2             # w1 tile (bf16)
                + th * 4                 # b1 tile (f32)
                + th * D * 2             # w2 tile (bf16)
                + D * 4                  # b2 (f32)
                + tm * D * out_itemsize) # output tile (f32)


# ----------------------------- Wrapper -----------------------------

def feed_forward(x, w1, b1, w2, b2, *, tm_target=512):
    """Fused FeedForward: relu(x @ w1 + b1) @ w2 + b2.

    x : (..., D) float32
    w1: (D, H), b1: (H,), w2: (H, D), b2: (D,)  (weights ideally pre-cast to bf16)
    Returns (..., D) float32.
    """
    orig_shape = x.shape
    D = orig_shape[-1]
    H = w1.shape[1]
    M = math.prod(orig_shape[:-1])

    # Pre-cast weights/biases (no-op if the caller already passed bf16 weights).
    w1_bf = w1 if w1.dtype == jnp.bfloat16 else w1.astype(jnp.bfloat16)
    w2_bf = w2 if w2.dtype == jnp.bfloat16 else w2.astype(jnp.bfloat16)
    b1_2d = b1.reshape(1, H).astype(jnp.float32)
    b2_2d = b2.reshape(1, D).astype(jnp.float32)
    x2 = x.reshape(M, D)

    # Per-generation VMEM budget (~75% of physical: ~48 MiB v7x, ~96 MiB v5e/v6e).
    vmem_budget = int(0.75 * _vmem_capacity_bytes())

    # Row tile: aligned to MXU-native / bf16-packing widths.
    tm = _pick_tile(M, tm_target, (256, 128, 16, 8))
    # Prefer >=2 row tiles when M splits cleanly (v7x megacore sharding).
    if M // tm < 2 and M % 2 == 0:
        half = M // 2
        for align in (256, 128, 16):
            if half % align == 0:
                tm = half
                break

    # Hidden tile: keep the weights fully VMEM-resident when they fit (fetched
    # exactly once, reused for every row tile); otherwise shrink th.
    th = H
    if _vmem_estimate(tm, th, D) > vmem_budget:
        align = 256 if H % 256 == 0 else (128 if H % 128 == 0 else H)
        best = align
        t = align
        while t <= H:
            if H % t == 0 and _vmem_estimate(tm, t, D) <= vmem_budget:
                best = t
            t += align
        th = best

    grid = (M // tm, H // th)

    cost = pl.CostEstimate(
        flops=4 * M * D * H,
        transcendentals=0,
        bytes_accessed=(M * D * 4 + D * H * 2 + H * 4 + H * D * 2 + D * 4
                        + M * D * 4),
    )

    out = pl.pallas_call(
        _ffn_kernel,
        out_shape=jax.ShapeDtypeStruct((M, D), jnp.float32),
        grid_spec=pltpu.PrefetchScalarGridSpec(
            num_scalar_prefetch=0,
            grid=grid,
            in_specs=[
                pl.BlockSpec((tm, D), lambda i, h: (i, 0)),   # x rows (f32)
                pl.BlockSpec((D, th), lambda i, h: (0, h)),   # w1 col slice (bf16)
                pl.BlockSpec((1, th), lambda i, h: (0, h)),   # b1 slice
                pl.BlockSpec((th, D), lambda i, h: (h, 0)),   # w2 row slice (bf16)
                pl.BlockSpec((1, D), lambda i, h: (0, 0)),    # b2
            ],
            out_specs=pl.BlockSpec((tm, D), lambda i, h: (i, 0)),
        ),
        compiler_params=pltpu.CompilerParams(
            dimension_semantics=("parallel", "arbitrary"),
            vmem_limit_bytes=vmem_budget,
        ),
        cost_estimate=cost,
    )(x2, w1_bf, b1_2d, w2_bf, b2_2d)

    return out.reshape(orig_shape)


# ----------------------------- Pure-JAX reference -----------------------------

def _reference_forward(x, w1, b1, w2, b2):
    h = jnp.maximum(x @ w1 + b1, 0.0)     # dropout is identity at inference
    return h @ w2 + b2


# ----------------------------- Main -----------------------------

if __name__ == "__main__":
    # Small shapes consistent with the module; d_model / hidden multiples of
    # 128 so every tile is lane-dense (full-width vector stores).
    B, S, D_MODEL, HIDDEN = 2, 8, 128, 512

    key = jax.random.PRNGKey(0)
    kx, k1, k2, k3, k4 = jax.random.split(key, 5)

    x = jax.random.normal(kx, (B, S, D_MODEL), dtype=jnp.float32)
    w1 = (0.1 * jax.random.normal(k1, (D_MODEL, HIDDEN))).astype(jnp.float32)
    b1 = (0.1 * jax.random.normal(k2, (HIDDEN,))).astype(jnp.float32)
    w2 = (0.1 * jax.random.normal(k3, (HIDDEN, D_MODEL))).astype(jnp.float32)
    b2 = (0.1 * jax.random.normal(k4, (D_MODEL,))).astype(jnp.float32)

    # Pre-cast static weights to bf16 once, outside the per-call path.
    w1_bf = w1.astype(jnp.bfloat16)
    w2_bf = w2.astype(jnp.bfloat16)

    out = feed_forward(x, w1_bf, b1, w2_bf, b2)
    out = jax.block_until_ready(out)

    ref = _reference_forward(x, w1, b1, w2, b2)
    assert out.shape == (B, S, D_MODEL)
    # Tolerance loosened vs f32 reference because matmul operands are bf16
    # (accumulation is f32 inside the kernel).
    assert jnp.allclose(out, ref, atol=5e-2, rtol=5e-2), "mismatch vs JAX reference"

    print("KERNEL_OK")
</pallas_src>

<mosaic_0001>
module attributes {stable_mosaic.version = 11 : i64} {
  func.func @_ffn_kernel(%arg0: i32, %arg1: i32, %arg2: memref<16x128xf32, #tpu.memory_space<vmem>>, %arg3: memref<128x512xbf16, #tpu.memory_space<vmem>>, %arg4: memref<1x512xf32, #tpu.memory_space<vmem>>, %arg5: memref<512x128xbf16, #tpu.memory_space<vmem>>, %arg6: memref<1x128xf32, #tpu.memory_space<vmem>>, %arg7: memref<16x128xf32, #tpu.memory_space<vmem>>) attributes {dimension_semantics = [#tpu.dimension_semantics<parallel>, #tpu.dimension_semantics<arbitrary>], iteration_bounds = array<i64: 1, 1>, scalar_prefetch = 0 : i64, scratch_operands = 0 : i64, tpu.core_type = #tpu.core_type<tc>, window_params = [{transform_indices = @transform_0, window_bounds = array<i64: 16, 128>}, {transform_indices = @transform_1, window_bounds = array<i64: 128, 512>}, {transform_indices = @transform_2, window_bounds = array<i64: 1, 512>}, {transform_indices = @transform_3, window_bounds = array<i64: 512, 128>}, {pipeline_mode = #tpu.pipeline_mode<synchronous>, transform_indices = @transform_4, window_bounds = array<i64: 1, 128>}, {transform_indices = @transform_5, window_bounds = array<i64: 16, 128>}]} {
    %c0_i32 = arith.constant 0 : i32
    %0 = arith.cmpi eq, %arg1, %c0_i32 : i32
    %1 = arith.extui %0 : i1 to i32
    %c0_i32_0 = arith.constant 0 : i32
    %2 = arith.cmpi ne, %1, %c0_i32_0 : i32
    scf.if %2 {
      %c0_14 = arith.constant 0 : index
      %c0_15 = arith.constant 0 : index
      %18 = vector.load %arg6[%c0_14, %c0_15] : memref<1x128xf32, #tpu.memory_space<vmem>>, vector<1x128xf32>
      %19 = vector.shape_cast %18 : vector<1x128xf32> to vector<1x128xf32>
      %20 = vector.broadcast %19 : vector<1x128xf32> to vector<16x128xf32>
      %c0_16 = arith.constant 0 : index
      %c0_17 = arith.constant 0 : index
      %21 = vector.load %arg7[%c0_16, %c0_17] : memref<16x128xf32, #tpu.memory_space<vmem>>, vector<16x128xf32>
      tpu.vector_store %arg7[%c0_16, %c0_17], %20 {strides = array<i32>} : memref<16x128xf32, #tpu.memory_space<vmem>>, vector<16x128xf32>,
    } else {
    }
    %c0 = arith.constant 0 : index
    %c0_1 = arith.constant 0 : index
    %3 = vector.load %arg2[%c0, %c0_1] : memref<16x128xf32, #tpu.memory_space<vmem>>, vector<16x128xf32>
    %4 = arith.truncf %3 : vector<16x128xf32> to vector<16x128xbf16>
    %c0_2 = arith.constant 0 : index
    %c0_3 = arith.constant 0 : index
    %5 = vector.load %arg3[%c0_2, %c0_3] : memref<128x512xbf16, #tpu.memory_space<vmem>>, vector<128x512xbf16>
    %cst = arith.constant dense<0.000000e+00> : vector<16x512xf32>
    %6 = tpu.matmul %4, %5, %cst {dimension_numbers = #tpu.dot_dimension_numbers<[1], [0], [0], [1], [0, 0, 1, 1], [], []>} : vector<16x128xbf16>, vector<128x512xbf16>, vector<16x512xf32> -> vector<16x512xf32>
    %c0_4 = arith.constant 0 : index
    %c0_5 = arith.constant 0 : index
    %7 = vector.load %arg4[%c0_4, %c0_5] : memref<1x512xf32, #tpu.memory_space<vmem>>, vector<1x512xf32>
    %8 = vector.broadcast %7 : vector<1x512xf32> to vector<16x512xf32>
    %9 = arith.addf %6, %8 : vector<16x512xf32>
    %cst_6 = arith.constant 0.000000e+00 : f32
    %10 = vector.broadcast %cst_6 : f32 to vector<16x512xf32>
    %11 = arith.maximumf %9, %10 : vector<16x512xf32>
    %c0_7 = arith.constant 0 : index
    %c0_8 = arith.constant 0 : index
    %12 = vector.load %arg7[%c0_7, %c0_8] : memref<16x128xf32, #tpu.memory_space<vmem>>, vector<16x128xf32>
    %13 = arith.truncf %11 : vector<16x512xf32> to vector<16x512xbf16>
    %c0_9 = arith.constant 0 : index
    %c0_10 = arith.constant 0 : index
    %14 = vector.load %arg5[%c0_9, %c0_10] : memref<512x128xbf16, #tpu.memory_space<vmem>>, vector<512x128xbf16>
    %cst_11 = arith.constant dense<0.000000e+00> : vector<16x128xf32>
    %15 = tpu.matmul %13, %14, %cst_11 {dimension_numbers = #tpu.dot_dimension_numbers<[1], [0], [0], [1], [0, 0, 1, 1], [], []>} : vector<16x512xbf16>, vector<512x128xbf16>, vector<16x128xf32> -> vector<16x128xf32>
    %16 = arith.addf %12, %15 : vector<16x128xf32>
    %c0_12 = arith.constant 0 : index
    %c0_13 = arith.constant 0 : index
    %17 = vector.load %arg7[%c0_12, %c0_13] : memref<16x128xf32, #tpu.memory_space<vmem>>, vector<16x128xf32>
    tpu.vector_store %arg7[%c0_12, %c0_13], %16 {strides = array<i32>} : memref<16x128xf32, #tpu.memory_space<vmem>>, vector<16x128xf32>,
    return
  }
  func.func @transform_0(%arg0: i32, %arg1: i32) -> (i32, i32) {
    %c0_i32 = arith.constant 0 : i32
    %c0_i32_0 = arith.constant 0 : i32
    return %arg0, %c0_i32 : i32, i32
  }
  func.func @transform_1(%arg0: i32, %arg1: i32) -> (i32, i32) {
    %c0_i32 = arith.constant 0 : i32
    %c0_i32_0 = arith.constant 0 : i32
    return %c0_i32, %arg1 : i32, i32
  }
  func.func @transform_2(%arg0: i32, %arg1: i32) -> (i32, i32) {
    %c0_i32 = arith.constant 0 : i32
    %c0_i32_0 = arith.constant 0 : i32
    return %c0_i32, %arg1 : i32, i32
  }
  func.func @transform_3(%arg0: i32, %arg1: i32) -> (i32, i32) {
    %c0_i32 = arith.constant 0 : i32
    %c0_i32_0 = arith.constant 0 : i32
    return %arg1, %c0_i32 : i32, i32
  }
  func.func @transform_4(%arg0: i32, %arg1: i32) -> (i32, i32) {
    %c0_i32 = arith.constant 0 : i32
    %c0_i32_0 = arith.constant 0 : i32
    %c0_i32_1 = arith.constant 0 : i32
    return %c0_i32, %c0_i32_0 : i32, i32
  }
  func.func @transform_5(%arg0: i32, %arg1: i32) -> (i32, i32) {
    %c0_i32 = arith.constant 0 : i32
    %c0_i32_0 = arith.constant 0 : i32
    return %arg0, %c0_i32 : i32, i32
  }
}

</mosaic_0001>

<bundles_post_ra>
// kernel: tpu_custom_call.1
= control target key start
LH: loop header
LB: loop body
LE: loop exit
PB: predicated region body
PF: predicated region fallthrough
CT: control target
= control target key end

     0   :  { %10 = vsyncpa [#allocation3], 0  ;;  %s1141_s0 = inlined_call_operand.hbm [shape: f32[16,128], index: 0, kind: input, shape index: {}]   ;;  %s1142_s1 = inlined_call_operand.hbm [shape: bf16[128,512], index: 1, kind: input, shape index: {}]   ;;  %s1143_s2 = inlined_call_operand.hbm [shape: f32[1,512], index: 2, kind: input, shape index: {}]   ;;  %s1144_s3 = inlined_call_operand.hbm [shape: bf16[512,128], index: 3, kind: input, shape index: {}]   ;;  %s1145_s4 = inlined_call_operand.vmem [shape: f32[1,128], index: 4, kind: input, shape index: {}]   ;;  %s1146_s5 = inlined_call_operand.hbm [shape: f32[16,128], index: 5, kind: output, shape index: {}]  }
   0x1   :  { %11 = vsyncpa [#allocation6], 0 }
   0x2   :  { %12 = vsyncpa [#allocation9], 0 }
   0x3   :  { %13 = vsyncpa [#allocation4], 0  ;;  %s1075_s18 = smov [#allocation5]  }
   0x4   :  { %s31_s19 = sshll.u32 %s1075_s18, 4  ;;  %s32_s19 = int_to_ptr.vmem [resolvable:$true] %s31_s19 }
   0x5   :  { %s975_s20 = scalar_lea.vmem %s32_s19, 4096  ;;  %p980_p1 = scmp.lt.s32.totalorder %s32_s19, %s32_s19 }
   0x6   :  { %p976_p0 = scmp.ne.s32.totalorder %s32_s19, %s975_s20  ;;  %p981_p2 = scmp.lt.s32.totalorder %s975_s20, %s975_s20 }
   0x8   :  { %p982_p3 = por %p981_p2, %p980_p1 }
   0xa   :  { %p983_p4 = pnand %p982_p3, %p976_p0 }
   0xc   :  { %986 = shalt.err (!%p983_p4)
}
   0xd   :  { %s1076_s21 = smov 256   ;;  %s1077_s22 = smov 16  }
   0xe   :  { %37 = dma.hbm_to_vmem [thread:$0]  %s1142_s1, 4096, %s32_s19, [#allocation6], %s1076_s21, %s1076_s21, %s1077_s22  }
   0xf   :  { %s1078_s25 = smov [#allocation2]  }
  0x10   :  { %s19_s26 = sshll.u32 %s1078_s25, 4  ;;  %s20_s26 = int_to_ptr.vmem [resolvable:$true] %s19_s26 }
  0x11   :  { %s995_s27 = scalar_lea.vmem %s20_s26, 256  ;;  %p1000_p6 = scmp.lt.s32.totalorder %s20_s26, %s20_s26 }
  0x12   :  { %p996_p5 = scmp.ne.s32.totalorder %s20_s26, %s995_s27  ;;  %p1001_p7 = scmp.lt.s32.totalorder %s995_s27, %s995_s27 }
  0x14   :  { %p1002_p8 = por %p1001_p7, %p1000_p6 }
  0x16   :  { %p1003_p9 = pnand %p1002_p8, %p996_p5 }
  0x18   :  { %1006 = shalt.err (!%p1003_p9)
}
  0x19   :  { %s1079_s28 = smov 128   ;;  %s1080_s29 = smov 8  }
  0x1a   :  { %25 = dma.hbm_to_vmem [thread:$0]  %s1141_s0, 256, %s20_s26, [#allocation3], %s1079_s28, %s1079_s28, %s1080_s29  }
  0x1b   :  { %s1081_s1 = smov [#allocation7]   ;;  %s1082_s8 = smov [#allocation8]  }
  0x1c   :  { %s44_s7 = sshll.u32 %s1081_s1, 4  ;;  %s53_s9 = sshll.u32 %s1082_s8, 4  ;;  %s45_s7 = int_to_ptr.vmem [resolvable:$true] %s44_s7  ;;  %s54_s9 = int_to_ptr.vmem [resolvable:$true] %s53_s9 }
  0x1d   :  { %s1015_s10 = scalar_lea.vmem %s45_s7, 64  ;;  %p1020_p11 = scmp.lt.s32.totalorder %s45_s7, %s45_s7 }
  0x1e   :  { %p1016_p10 = scmp.ne.s32.totalorder %s45_s7, %s1015_s10  ;;  %p1021_p12 = scmp.lt.s32.totalorder %s1015_s10, %s1015_s10 }
  0x20   :  { %p1022_p13 = por %p1021_p12, %p1020_p11 }
  0x22   :  { %p1023_p0 = pnand %p1022_p13, %p1016_p10 }
  0x24   :  { %1026 = shalt.err (!%p1023_p0)
}
  0x25   :  { %47 = dma.hbm_to_vmem [thread:$0]  %s1143_s2, 64, %s45_s7, [#allocation6]  }
  0x26   :  { %s1035_s13 = scalar_lea.vmem %s54_s9, 4096  ;;  %p1040_p2 = scmp.lt.s32.totalorder %s54_s9, %s54_s9 }
  0x27   :  { %p1036_p1 = scmp.ne.s32.totalorder %s54_s9, %s1035_s13  ;;  %p1041_p3 = scmp.lt.s32.totalorder %s1035_s13, %s1035_s13 }
  0x29   :  { %p1042_p4 = por %p1041_p3, %p1040_p2 }
  0x2b   :  { %p1043_p5 = pnand %p1042_p4, %p1036_p1 }
  0x2d   :  { %1046 = shalt.err (!%p1043_p5)
}
  0x2e   :  { %s1083_s0 = smov 64   ;;  %s1084_s14 = smov 4  }
  0x2f   :  { %59 = dma.hbm_to_vmem [thread:$0]  %s1144_s3, 4096, %s54_s9, [#allocation9], %s1083_s0, %s1083_s0, %s1084_s14  }
  0x30   :  { %1067 = dma.done.wait [#allocation3], 256  }
  0x31   :  { %1068 = vsyncadd [#allocation3], 4294967040 }
  0x32   :  { %1069 = dma.done.wait [#allocation6], 4160  }
  0x33   :  { %1070 = vsyncadd [#allocation6], 4294963136 }
  0x34   :  { %1071 = dma.done.wait [#allocation9], 4096  }
  0x35   :  { %1072 = vsyncadd [#allocation9], 4294963200  ;;  %v1085_v0 = vmov 0   ;;  %v887_v1 = vld [vmem:[#allocation5 + $0xe4] ss:$16 sps:$4 sm:$0xff]   ;;  %v89_v34 = vld [vmem:[#allocation2 + $0x8] sm:$0xff] }
  0x36   :  { %337 = vmatprep.mubr.bf16.mxu0 %v1085_v0  ;;  %380 = vmatprep.mubr.bf16.mxu1 %v1085_v0  ;;  %v889_v2 = vld [vmem:[#allocation5 + $0xec] ss:$16 sps:$4 sm:$0xff]   ;;  %v891_v3 = vld [vmem:[#allocation5 + $0xe0] ss:$16 sps:$4 sm:$0xff]   ;;  %v892_v4 = vld [vmem:[#allocation5 + $0xe8] ss:$16 sps:$4 sm:$0xff]  }
  0x37   :  { %305 = vmatprep.subr.bf16.mxu0 %v887_v1  ;;  %348 = vmatprep.subr.bf16.mxu1 %v889_v2  ;;  %v893_v5 = vld [vmem:[#allocation5 + $0xc4] ss:$16 sps:$4 sm:$0xff]   ;;  %v895_v6 = vld [vmem:[#allocation5 + $0xcc] ss:$16 sps:$4 sm:$0xff]   ;;  %v897_v7 = vld [vmem:[#allocation5 + $0xc0] ss:$16 sps:$4 sm:$0xff]  }
  0x38   :  { %306 = vmatpush1.bf16.msra.mxu0 %v891_v3  ;;  %349 = vmatpush1.bf16.msra.mxu1 %v892_v4  ;;  %v898_v8 = vld [vmem:[#allocation5 + $0xc8] ss:$16 sps:$4 sm:$0xff]   ;;  %v899_v9 = vld [vmem:[#allocation5 + $0xa4] ss:$16 sps:$4 sm:$0xff]   ;;  %v901_v10 = vld [vmem:[#allocation5 + $0xac] ss:$16 sps:$4 sm:$0xff]   ;;  %v125_v4 = vlaneseq }
  0x39   :  { %307 = vmatprep.subr.bf16.mxu0 %v893_v5  ;;  %350 = vmatprep.subr.bf16.mxu1 %v895_v6  ;;  %v903_v11 = vld [vmem:[#allocation5 + $0xa0] ss:$16 sps:$4 sm:$0xff]   ;;  %v904_v12 = vld [vmem:[#allocation5 + $0xa8] ss:$16 sps:$4 sm:$0xff]   ;;  %v905_v13 = vld [vmem:[#allocation5 + $0x84] ss:$16 sps:$4 sm:$0xff]  }
  0x3a   :  { %v907_v14 = vld [vmem:[#allocation5 + $0x8c] ss:$16 sps:$4 sm:$0xff]   ;;  %v909_v15 = vld [vmem:[#allocation5 + $0x80] ss:$16 sps:$4 sm:$0xff]   ;;  %v910_v16 = vld [vmem:[#allocation5 + $0x88] ss:$16 sps:$4 sm:$0xff]  }
  0x3b   :  { %v911_v17 = vld [vmem:[#allocation5 + $0x64] ss:$16 sps:$4 sm:$0xff]   ;;  %v913_v18 = vld [vmem:[#allocation5 + $0x6c] ss:$16 sps:$4 sm:$0xff]   ;;  %v915_v19 = vld [vmem:[#allocation5 + $0x60] ss:$16 sps:$4 sm:$0xff]  }
  0x3c   :  { %308 = vmatpush1.bf16.msra.mxu0 %v897_v7  ;;  %351 = vmatpush1.bf16.msra.mxu1 %v898_v8  ;;  %v916_v20 = vld [vmem:[#allocation5 + $0x68] ss:$16 sps:$4 sm:$0xff]   ;;  %v917_v21 = vld [vmem:[#allocation5 + $0x44] ss:$16 sps:$4 sm:$0xff]   ;;  %v919_v22 = vld [vmem:[#allocation5 + $0x4c] ss:$16 sps:$4 sm:$0xff]  }
  0x3d   :  { %309 = vmatprep.subr.bf16.mxu0 %v899_v9  ;;  %352 = vmatprep.subr.bf16.mxu1 %v901_v10  ;;  %v921_v23 = vld [vmem:[#allocation5 + $0x40] ss:$16 sps:$4 sm:$0xff]   ;;  %v922_v24 = vld [vmem:[#allocation5 + $0x48] ss:$16 sps:$4 sm:$0xff]   ;;  %v923_v25 = vld [vmem:[#allocation5 + $0x24] ss:$16 sps:$4 sm:$0xff]  }
  0x3e   :  { %v925_v26 = vld [vmem:[#allocation5 + $0x2c] ss:$16 sps:$4 sm:$0xff]   ;;  %v927_v27 = vld [vmem:[#allocation5 + $0x20] ss:$16 sps:$4 sm:$0xff]   ;;  %v928_v28 = vld [vmem:[#allocation5 + $0x28] ss:$16 sps:$4 sm:$0xff]  }
  0x3f   :  { %v929_v29 = vld [vmem:[#allocation5 + $0x4] ss:$16 sps:$4 sm:$0xff]   ;;  %v931_v30 = vld [vmem:[#allocation5 + $0xc] ss:$16 sps:$4 sm:$0xff]   ;;  %v933_v31 = vld [vmem:[#allocation5] ss:$16 sps:$4 sm:$0xff]  }
  0x40   :  { %310 = vmatpush1.bf16.msra.mxu0 %v903_v11  ;;  %353 = vmatpush1.bf16.msra.mxu1 %v904_v12  ;;  %v934_v32 = vld [vmem:[#allocation5 + $0x8] ss:$16 sps:$4 sm:$0xff]   ;;  %v88_v33 = vld [vmem:[#allocation2] sm:$0xff]  ;;  %v935_v35 = vld [vmem:[#allocation8 + $0x78] sm:$0xff]   ;;  %v126_v5 = vshrl.u32 %v125_v4, 7  ;;  %s1086_s17 = smov [#allocation10]  }
  0x41   :  { %311 = vmatprep.subr.bf16.mxu0 %v905_v13  ;;  %354 = vmatprep.subr.bf16.mxu1 %v907_v14  ;;  %v936_v36 = vld [vmem:[#allocation8 + $0xf8] sm:$0xff]   ;;  %v90_v38 = vpack.c.bf16 %v89_v34, %v88_v33  ;;  %v939_v40 = vld [vmem:[#allocation8 + $0x70] sm:$0xff]   ;;  %v943_v44 = vld [vmem:[#allocation8 + $0x68] sm:$0xff]   ;;  %s752_s18 = sshll.u32 %s1086_s17, 4  ;;  %s753_s18 = int_to_ptr.vmem [resolvable:$true] %s752_s18 }
  0x42   :  { %v937_v37 = vld [vmem:[#allocation8 + $0x38] sm:$0xff]   ;;  %v940_v41 = vld [vmem:[#allocation8 + $0xf0] sm:$0xff]   ;;  %v944_v45 = vld [vmem:[#allocation8 + $0xe8] sm:$0xff]   ;;  %v131_v6 = vsub.s32 1, %v126_v5  ;;  %v139_v7 = vsub.s32 3, %v126_v5  ;;  %v127_v8 = vsub.s32 0, %v126_v5  ;;  %p1052_p7 = scmp.lt.s32.totalorder %s753_s18, %s753_s18 }
  0x43   :  { %v938_v39 = vld [vmem:[#allocation8 + $0xb8] sm:$0xff]   ;;  %v941_v42 = vld [vmem:[#allocation8 + $0x30] sm:$0xff]   ;;  %v945_v46 = vld [vmem:[#allocation8 + $0x28] sm:$0xff]   ;;  %v135_v9 = vsub.s32 2, %v126_v5  ;;  %s1047_s19 = scalar_lea.vmem %s753_s18, 256 }
  0x44   :  { %312 = vmatpush1.bf16.msra.mxu0 %v909_v15  ;;  %355 = vmatpush1.bf16.msra.mxu1 %v910_v16  ;;  %v942_v43 = vld [vmem:[#allocation8 + $0xb0] sm:$0xff]   ;;  %v946_v47 = vld [vmem:[#allocation8 + $0xa8] sm:$0xff]   ;;  %v947_v48 = vld [vmem:[#allocation8 + $0x60] sm:$0xff]   ;;  %p1048_p6 = scmp.ne.s32.totalorder %s753_s18, %s1047_s19  ;;  %p1053_p8 = scmp.lt.s32.totalorder %s1047_s19, %s1047_s19 }
  0x45   :  { %313 = vmatprep.subr.bf16.mxu0 %v911_v17  ;;  %356 = vmatprep.subr.bf16.mxu1 %v913_v18  ;;  %v948_v49 = vld [vmem:[#allocation8 + $0xe0] sm:$0xff]   ;;  %v951_v52 = vld [vmem:[#allocation8 + $0x58] sm:$0xff]   ;;  %v955_v56 = vld [vmem:[#allocation8 + $0x50] sm:$0xff]  }
  0x46   :  { %v949_v50 = vld [vmem:[#allocation8 + $0x20] sm:$0xff]   ;;  %v952_v53 = vld [vmem:[#allocation8 + $0xd8] sm:$0xff]   ;;  %v956_v57 = vld [vmem:[#allocation8 + $0xd0] sm:$0xff]   ;;  %p1054_p9 = por %p1053_p8, %p1052_p7 }
  0x47   :  { %v950_v51 = vld [vmem:[#allocation8 + $0xa0] sm:$0xff]   ;;  %v953_v54 = vld [vmem:[#allocation8 + $0x18] sm:$0xff]   ;;  %v957_v58 = vld [vmem:[#allocation8 + $0x10] sm:$0xff]  }
  0x48   :  { %314 = vmatpush1.bf16.msra.mxu0 %v915_v19  ;;  %357 = vmatpush1.bf16.msra.mxu1 %v916_v20  ;;  %v954_v55 = vld [vmem:[#allocation8 + $0x98] sm:$0xff]   ;;  %v958_v59 = vld [vmem:[#allocation8 + $0x90] sm:$0xff]   ;;  %v959_v60 = vld [vmem:[#allocation8 + $0x48] sm:$0xff]   ;;  %p1055_p10 = pnand %p1054_p9, %p1048_p6 }
  0x49   :  { %315 = vmatprep.subr.bf16.mxu0 %v917_v21  ;;  %358 = vmatprep.subr.bf16.mxu1 %v919_v22  ;;  %v960_v61 = vld [vmem:[#allocation8 + $0xc8] sm:$0xff]   ;;  %v963_v0 = vld [vmem:[#allocation8 + $0x40] sm:$0xff]   ;;  %v123_v10 = vld [vmem:[#allocation7] sm:$0xf] }
  0x4a   :  { %v961_v62 = vld [vmem:[#allocation8 + $0x8] sm:$0xff]   ;;  %v964_v1 = vld [vmem:[#allocation8 + $0xc0] sm:$0xff]   ;;  %v132_v13 = vrot.slane %v123_v10, %v131_v6  ;;  %v140_v14 = vrot.slane %v123_v10, %v139_v7  ;;  %v128_v15 = vrot.slane %v123_v10, %v127_v8  ;;  %v136_v16 = vrot.slane %v123_v10, %v135_v9 }
  0x4b   :  { %v962_v63 = vld [vmem:[#allocation8 + $0x88] sm:$0xff]   ;;  %v965_v2 = vld [vmem:[#allocation8] sm:$0xff]  }
  0x4c   :  { %316 = vmatpush1.bf16.msra.mxu0 %v921_v23  ;;  %359 = vmatpush1.bf16.msra.mxu1 %v922_v24  ;;  %v966_v3 = vld [vmem:[#allocation8 + $0x80] sm:$0xff]  }
  0x4d   :  { %317 = vmatprep.subr.bf16.mxu0 %v923_v25  ;;  %360 = vmatprep.subr.bf16.mxu1 %v925_v26 }
  0x50   :  { %318 = vmatpush1.bf16.msra.mxu0 %v927_v27  ;;  %361 = vmatpush1.bf16.msra.mxu1 %v928_v28 }
  0x51   :  { %319 = vmatprep.subr.bf16.mxu0 %v929_v29  ;;  %362 = vmatprep.subr.bf16.mxu1 %v931_v30 }
  0x54   :  { %320 = vmatpush1.bf16.msra.mxu0 %v933_v31  ;;  %363 = vmatpush1.bf16.msra.mxu1 %v934_v32 }
  0x55   :  { %831 = vmatprep.subr.bf16.mxu0 %v935_v35  ;;  %853 = vmatprep.subr.bf16.mxu1 %v936_v36 }
  0x57   :  { %338 = vmatmul.mubr.bf16.vlgmr.msra.gmra.mxu0 %v90_v38  ;;  %381 = vmatmul.mubr.bf16.vlgmr.msra.gmra.mxu1 %v90_v38 }
  0x58   :  { %832 = vmatpush3.bf16.msra.mxu0 %v937_v37  ;;  %854 = vmatpush3.bf16.msra.mxu1 %v938_v39 }
  0x59   :  { %833 = vmatprep.subr.bf16.mxu0 %v939_v40  ;;  %855 = vmatprep.subr.bf16.mxu1 %v940_v41 }
  0x5c   :  { %834 = vmatpush3.bf16.msra.mxu0 %v941_v42  ;;  %856 = vmatpush3.bf16.msra.mxu1 %v942_v43 }
  0x5d   :  { %835 = vmatprep.subr.bf16.mxu0 %v943_v44  ;;  %857 = vmatprep.subr.bf16.mxu1 %v944_v45 }
  0x60   :  { %836 = vmatpush3.bf16.msra.mxu0 %v945_v46  ;;  %858 = vmatpush3.bf16.msra.mxu1 %v946_v47 }
  0x61   :  { %837 = vmatprep.subr.bf16.mxu0 %v947_v48  ;;  %859 = vmatprep.subr.bf16.mxu1 %v948_v49  ;;  %v766_v49 = vld [vmem:[%s1145_s4] ss:$0 sm:$0xff] }
  0x64   :  { %838 = vmatpush3.bf16.msra.mxu0 %v949_v50  ;;  %860 = vmatpush3.bf16.msra.mxu1 %v950_v51 }
  0x65   :  { %839 = vmatprep.subr.bf16.mxu0 %v951_v52  ;;  %861 = vmatprep.subr.bf16.mxu1 %v952_v53 }
  0x68   :  { %840 = vmatpush3.bf16.msra.mxu0 %v953_v54  ;;  %862 = vmatpush3.bf16.msra.mxu1 %v954_v55 }
  0x69   :  { %841 = vmatprep.subr.bf16.mxu0 %v955_v56  ;;  %863 = vmatprep.subr.bf16.mxu1 %v956_v57 }
  0x6c   :  { %842 = vmatpush3.bf16.msra.mxu0 %v957_v58  ;;  %864 = vmatpush3.bf16.msra.mxu1 %v958_v59 }
  0x6d   :  { %843 = vmatprep.subr.bf16.mxu0 %v959_v60  ;;  %865 = vmatprep.subr.bf16.mxu1 %v960_v61 }
  0x70   :  { %844 = vmatpush3.bf16.msra.mxu0 %v961_v62  ;;  %866 = vmatpush3.bf16.msra.mxu1 %v962_v63 }
  0x71   :  { %845 = vmatprep.subr.bf16.mxu0 %v963_v0  ;;  %867 = vmatprep.subr.bf16.mxu1 %v964_v1 }
  0x74   :  { %846 = vmatpush3.bf16.msra.mxu0 %v965_v2  ;;  %868 = vmatpush3.bf16.msra.mxu1 %v966_v3 }
 0x117   :  { %v339_v11 = vpop.f32.mrf.mxu0  ;;  %v382_v12 = vpop.f32.mrf.mxu1 }
 0x118   :  { %v340_v25 = vadd.f32 %v339_v11, %v128_v15  ;;  %v383_v26 = vadd.f32 %v382_v12, %v136_v16 }
 0x119   :  { %v341_v17 = vpop.f32.mrf.mxu0  ;;  %v384_v18 = vpop.f32.mrf.mxu1 }
 0x11a   :  { %v342_v21 = vadd.f32 %v341_v17, %v132_v13  ;;  %v385_v22 = vadd.f32 %v384_v18, %v140_v14  ;;  %v391_v37 = vmax.f32 %v340_v25, 0.0  ;;  %v393_v38 = vmax.f32 %v383_v26, 0.0 }
 0x11b   :  { %v343_v19 = vpop.f32.mrf.mxu0  ;;  %v386_v20 = vpop.f32.mrf.mxu1 }
 0x11c   :  { %v344_v23 = vadd.f32 %v343_v19, %v128_v15  ;;  %v387_v24 = vadd.f32 %v386_v20, %v136_v16  ;;  %v392_v33 = vmax.f32 %v342_v21, 0.0  ;;  %v394_v34 = vmax.f32 %v385_v22, 0.0 }
 0x11d   :  { %v345_v27 = vpop.f32.mrf.mxu0  ;;  %v388_v28 = vpop.f32.mrf.mxu1 }
 0x11e   :  { %v346_v29 = vadd.f32 %v345_v27, %v132_v13  ;;  %v389_v30 = vadd.f32 %v388_v28, %v140_v14  ;;  %v395_v31 = vmax.f32 %v344_v23, 0.0  ;;  %v397_v32 = vmax.f32 %v387_v24, 0.0 }
 0x120   :  { %v396_v35 = vmax.f32 %v346_v29, 0.0  ;;  %v398_v36 = vmax.f32 %v389_v30, 0.0  ;;  %v401_v41 = vpack.c.bf16 %v395_v31, %v391_v37  ;;  %v403_v42 = vpack.c.bf16 %v397_v32, %v393_v38 }
 0x122   :  { %v402_v39 = vpack.c.bf16 %v396_v35, %v392_v33  ;;  %v404_v40 = vpack.c.bf16 %v398_v36, %v394_v34 }
 0x124   :  { %693 = vmatprep.mubr.bf16.mxu0 %v402_v39  ;;  %734 = vmatprep.mubr.bf16.mxu1 %v404_v40 }
 0x125   :  { %694 = vmatmul.mubr.bf16.vlgmr.msra.gmra.mxu0 %v401_v41  ;;  %735 = vmatmul.mubr.bf16.vlgmr.msra.gmra.mxu1 %v403_v42 }
 0x1e5   :  { %v847_v43 = vpop.f32.mrf.mxu0  ;;  %v869_v44 = vpop.f32.mrf.mxu1 }
 0x1e7   :  { %v848_v45 = vpop.f32.mrf.mxu0  ;;  %v870_v46 = vpop.f32.mrf.mxu1 }
 0x1e8   :  { %v849_v47 = vadd.f32 %v848_v45, %v847_v43  ;;  %v871_v48 = vadd.f32 %v870_v46, %v869_v44 }
 0x1e9   :  { %v850_v50 = vpop.f32.mrf.mxu0  ;;  %v872_v51 = vpop.f32.mrf.mxu1 }
 0x1ea   :  { %v737_v52 = vadd.f32 %v871_v48, %v849_v47 }
 0x1eb   :  { %v851_v53 = vpop.f32.mrf.mxu0  ;;  %v873_v54 = vpop.f32.mrf.mxu1 }
 0x1ec   :  { %v743_v55 = vadd.f32 %v766_v49, %v737_v52  ;;  %v852_v56 = vadd.f32 %v851_v53, %v850_v50  ;;  %v874_v57 = vadd.f32 %v873_v54, %v872_v51 }
 0x1ee   :  { %745 = vst [vmem:[#allocation10] sm:$0xff] %v743_v55  ;;  %v740_v58 = vadd.f32 %v874_v57, %v852_v56 }
 0x1f0   :  { %v744_v59 = vadd.f32 %v766_v49, %v740_v58 }
 0x1f2   :  { %746 = vst [vmem:[#allocation10 + $0x8] sm:$0xff] %v744_v59 }
 0x1f3   :  { %1058 = shalt.err (!%p1055_p10)
}
 0x1f4   :  { %758 = dma.vmem_to_hbm [thread:$0]  %s753_s18, 256, %s1146_s5, [#allocation4], %s1079_s28, %s1079_s28, %s1080_s29  }
 0x1f5   :  { %1073 = dma.done.wait [#allocation4], 256  }
 0x1f6   :  { %1074 = vsyncadd [#allocation4], 4294967040 }
 0x1f7   :  { %762 = vsyncpa [#allocation3], 1 }
 0x1f8   :  { %763 = vsyncpa [#allocation6], 1 }
 0x1f9   :  { %764 = vsyncpa [#allocation9], 1 }
 0x1fa   :  { %765 = vsyncpa [#allocation4], 1 }

</bundles_post_ra>
